<compile_context>
chip_gen: v6e
topology: v6e:2x2x1
jax: 0.10.0
libtpu: 0.0.40
codegen_flags: <defaults>
</compile_context>

<pallas_src>
import functools

import jax
import jax.numpy as jnp
from jax import lax
from jax.experimental import pallas as pl
from jax.experimental.pallas import tpu as pltpu


def _round_up(x, m):
    return (x + m - 1) // m * m


# ---------------------------------------------------------------------------
# Kernel 1: hoisted input projection  gates_x = X @ W_ih^T + (b_ih + b_hh)
# (one big GEMM over all T*B rows; not recurrent)
# ---------------------------------------------------------------------------
def _input_proj_kernel(x_ref, w_ref, b_ref, o_ref):
    o_ref[...] = (
        jnp.dot(x_ref[...], w_ref[...], preferred_element_type=jnp.float32)
        + b_ref[...].astype(jnp.float32)
    ).astype(o_ref.dtype)


def input_projection(x2d, w, b_row, *, row_tile=256):
    """x2d: (rows, E) bf16, w: (E, G) bf16, b_row: (1, G) f32 -> (rows, G) f32."""
    rows, E = x2d.shape
    G = w.shape[1]
    tm = min(row_tile, _round_up(rows, 8))
    rows_p = _round_up(rows, tm)
    if rows_p != rows:
        x2d = jnp.pad(x2d, ((0, rows_p - rows), (0, 0)))

    out = pl.pallas_call(
        _input_proj_kernel,
        out_shape=jax.ShapeDtypeStruct((rows_p, G), jnp.float32),
        grid_spec=pltpu.PrefetchScalarGridSpec(
            num_scalar_prefetch=0,
            grid=(rows_p // tm,),
            in_specs=[
                pl.BlockSpec((tm, E), lambda i: (i, 0)),
                pl.BlockSpec((E, G), lambda i: (0, 0)),
                pl.BlockSpec((1, G), lambda i: (0, 0)),
            ],
            out_specs=pl.BlockSpec((tm, G), lambda i: (i, 0)),
        ),
        compiler_params=pltpu.CompilerParams(
            dimension_semantics=("parallel",),
            vmem_limit_bytes=64 * 1024 * 1024,
        ),
    )(x2d, w, b_row)
    return out[:rows]


# ---------------------------------------------------------------------------
# Kernel 2: recurrent LSTM over pre-projected gates.
# grid = (batch_tiles [parallel], time_chunks [arbitrary]); Tc steps per call.
# ---------------------------------------------------------------------------
def _lstm_recurrent_kernel(gx_ref, whh_ref, h0_ref, c0_ref,
                           out_ref, hn_ref, cn_ref,
                           h_sc, c_sc,
                           *, hidden_pad, chunk, dot_dtype):
    tc = pl.program_id(1)

    @pl.when(tc == 0)
    def _():
        h_sc[...] = h0_ref[...].astype(jnp.float32)
        c_sc[...] = c0_ref[...].astype(jnp.float32)

    Hp = hidden_pad
    whh = whh_ref[...]                      # (Hp, 4Hp) bf16, loaded once per chunk

    def step(s, carry):
        h, c = carry
        # x-projection was hoisted; only the recurrent matmul remains here.
        gates = gx_ref[s] + jnp.dot(h.astype(dot_dtype), whh,
                                    preferred_element_type=jnp.float32)
        # Hp is a multiple of 128 -> every gate slice is lane-aligned.
        i_g = jax.nn.sigmoid(gates[:, 0 * Hp:1 * Hp])
        f_g = jax.nn.sigmoid(gates[:, 1 * Hp:2 * Hp])
        g_g = jnp.tanh(gates[:, 2 * Hp:3 * Hp])
        o_g = jax.nn.sigmoid(gates[:, 3 * Hp:4 * Hp])
        c_new = f_g * c + i_g * g_g
        h_new = o_g * jnp.tanh(c_new)
        out_ref[s] = h_new.astype(out_ref.dtype)   # lane-dense (Hp % 128 == 0)
        return h_new, c_new

    init = (h_sc[...], c_sc[...])
    if chunk <= 16:
        # small fixed trip count -> fully unroll at trace time
        carry = init
        for s in range(chunk):
            carry = step(s, carry)
        h_f, c_f = carry
    else:
        h_f, c_f = lax.fori_loop(0, chunk, step, init, unroll=8)

    h_sc[...] = h_f
    c_sc[...] = c_f

    @pl.when(tc == pl.num_programs(1) - 1)
    def _():
        hn_ref[...] = h_f.astype(hn_ref.dtype)
        cn_ref[...] = c_f.astype(cn_ref.dtype)


def lstm_recurrence(gates_x, whh_t, h0, c0, *, time_chunk=None, batch_tile=None,
                    dot_dtype=jnp.bfloat16, out_dtype=jnp.float32):
    """gates_x: (T, B, 4Hp) f32, whh_t: (Hp, 4Hp), h0/c0: (B, Hp) f32."""
    T, B, G = gates_x.shape
    Hp = whh_t.shape[0]
    assert G == 4 * Hp

    if time_chunk is None:
        if T <= 32:
            time_chunk = T                    # whole sequence in one grid step
        else:
            time_chunk = next(d for d in (32, 16, 8, 4, 2, 1) if T % d == 0)
    assert T % time_chunk == 0
    n_chunks = T // time_chunk

    if batch_tile is None:
        batch_tile = B
        # Shard the (independent) batch recurrences across TensorCores (v7x
        # megacore) when the tiles stay (8, .)-aligned.
        if B % 16 == 0:
            batch_tile = B // 2
    assert B % batch_tile == 0
    n_btiles = B // batch_tile

    kernel = functools.partial(
        _lstm_recurrent_kernel,
        hidden_pad=Hp, chunk=time_chunk, dot_dtype=dot_dtype)

    out_shapes = (
        jax.ShapeDtypeStruct((T, B, Hp), out_dtype),
        jax.ShapeDtypeStruct((B, Hp), out_dtype),
        jax.ShapeDtypeStruct((B, Hp), out_dtype),
    )

    grid_spec = pltpu.PrefetchScalarGridSpec(
        num_scalar_prefetch=0,
        grid=(n_btiles, n_chunks),
        in_specs=[
            pl.BlockSpec((time_chunk, batch_tile, G), lambda b, t: (t, b, 0)),
            pl.BlockSpec((Hp, G), lambda b, t: (0, 0)),            # W_hh^T (resident)
            pl.BlockSpec((batch_tile, Hp), lambda b, t: (b, 0)),   # h0 (read at t==0)
            pl.BlockSpec((batch_tile, Hp), lambda b, t: (b, 0)),   # c0 (read at t==0)
        ],
        out_specs=[
            pl.BlockSpec((time_chunk, batch_tile, Hp), lambda b, t: (t, b, 0)),
            pl.BlockSpec((batch_tile, Hp), lambda b, t: (b, 0)),
            pl.BlockSpec((batch_tile, Hp), lambda b, t: (b, 0)),
        ],
        scratch_shapes=[
            pltpu.VMEM((batch_tile, Hp), jnp.float32),   # h state (f32)
            pltpu.VMEM((batch_tile, Hp), jnp.float32),   # c state (f32)
        ],
    )

    return pl.pallas_call(
        kernel,
        out_shape=out_shapes,
        grid_spec=grid_spec,
        compiler_params=pltpu.CompilerParams(
            dimension_semantics=("parallel", "arbitrary"),  # batch ∥, time serial
            vmem_limit_bytes=64 * 1024 * 1024,
        ),
    )(gates_x, whh_t, h0, c0)


# ---------------------------------------------------------------------------
# Parameter handling / wrapper mirroring Encoder.forward
# ---------------------------------------------------------------------------
def _pad_gates(w, H, Hp):
    """Zero-pad each of the 4 gate blocks of a (4H, ...) tensor to (4Hp, ...)."""
    tail = w.shape[1:]
    w4 = w.reshape((4, H) + tail)
    pad = [(0, 0), (0, Hp - H)] + [(0, 0)] * len(tail)
    return jnp.pad(w4, pad).reshape((4 * Hp,) + tail)


def init_encoder_params(key, embedding_dim, hidden_dim):
    """Synthetic init matching torch.nn.LSTM parameter shapes / uniform(-1/sqrt(H), 1/sqrt(H))."""
    k = 1.0 / jnp.sqrt(jnp.float32(hidden_dim))
    keys = jax.random.split(key, 4)
    w_ih = jax.random.uniform(keys[0], (4 * hidden_dim, embedding_dim), jnp.float32, -k, k)
    w_hh = jax.random.uniform(keys[1], (4 * hidden_dim, hidden_dim), jnp.float32, -k, k)
    b_ih = jax.random.uniform(keys[2], (4 * hidden_dim,), jnp.float32, -k, k)
    b_hh = jax.random.uniform(keys[3], (4 * hidden_dim,), jnp.float32, -k, k)
    return dict(w_ih=w_ih, w_hh=w_hh, b_ih=b_ih, b_hh=b_hh)


def encoder_forward(params, x, hidden, *, time_chunk=None, batch_tile=None,
                    dot_dtype=jnp.bfloat16):
    """Mirrors Encoder.forward(x, hidden) for rnn_mode='LSTM', num_layers=1,
    bidirectional=False, dropout=None.

    x : (B, T, E)  (batch_first=True);  hidden = (h0, c0), each (1, B, H).
    Returns (output (B, T, H), (h_n (1,B,H), c_n (1,B,H))).
    """
    h0, c0 = hidden
    B, T, E = x.shape
    H = params["w_hh"].shape[1]
    Hp = _round_up(H, 128)          # lane-aligned gates and lane-dense stores

    # Pad per-gate so gate order [i, f, g, o] (torch layout) is preserved.
    w_ih_p = _pad_gates(params["w_ih"], H, Hp)                       # (4Hp, E)
    w_hh_p = _pad_gates(params["w_hh"], H, Hp)                       # (4Hp, H)
    w_hh_p = jnp.pad(w_hh_p, ((0, 0), (0, Hp - H)))                  # (4Hp, Hp)
    bias_p = _pad_gates((params["b_ih"] + params["b_hh"])[:, None], H, Hp)[:, 0]

    # Hoisted input projection: one big GEMM over all T*B rows.
    x_tbe = jnp.transpose(x, (1, 0, 2))                              # (T, B, E)
    x2d = x_tbe.reshape(T * B, E).astype(dot_dtype)
    gates_x = input_projection(x2d, w_ih_p.T.astype(dot_dtype), bias_p[None, :])
    gates_x = gates_x.reshape(T, B, 4 * Hp)                          # f32

    h0p = jnp.pad(h0[0], ((0, 0), (0, Hp - H)))                      # (B, Hp)
    c0p = jnp.pad(c0[0], ((0, 0), (0, Hp - H)))

    out_p, hn_p, cn_p = lstm_recurrence(
        gates_x, w_hh_p.T.astype(dot_dtype), h0p, c0p,
        time_chunk=time_chunk, batch_tile=batch_tile, dot_dtype=dot_dtype)

    output = jnp.transpose(out_p[:, :, :H], (1, 0, 2))               # (B, T, H)
    # dropout=None in the reference module -> no dropout applied.
    return output, (hn_p[None, :, :H], cn_p[None, :, :H])


# ---------------------------------------------------------------------------
# Pure-JAX reference (same math as torch.nn.LSTM forward), f32 throughout.
# ---------------------------------------------------------------------------
def _reference_lstm(params, x, hidden):
    h0, c0 = hidden
    w_ih, w_hh = params["w_ih"], params["w_hh"]
    b = params["b_ih"] + params["b_hh"]
    H = w_hh.shape[1]

    def step(carry, x_t):
        h, c = carry
        gates = x_t @ w_ih.T + h @ w_hh.T + b
        i = jax.nn.sigmoid(gates[:, 0 * H:1 * H])
        f = jax.nn.sigmoid(gates[:, 1 * H:2 * H])
        g = jnp.tanh(gates[:, 2 * H:3 * H])
        o = jax.nn.sigmoid(gates[:, 3 * H:4 * H])
        c_new = f * c + i * g
        h_new = o * jnp.tanh(c_new)
        return (h_new, c_new), h_new

    (h_n, c_n), out_tbh = lax.scan(step, (h0[0], c0[0]), jnp.transpose(x, (1, 0, 2)))
    return jnp.transpose(out_tbh, (1, 0, 2)), (h_n[None], c_n[None])


if __name__ == "__main__":
    B, T, E, H = 2, 8, 32, 32

    key = jax.random.PRNGKey(0)
    k_param, k_x, k_h, k_c = jax.random.split(key, 4)

    params = init_encoder_params(k_param, E, H)
    x = jax.random.normal(k_x, (B, T, E), jnp.float32)
    h0 = jax.random.normal(k_h, (1, B, H), jnp.float32)
    c0 = jax.random.normal(k_c, (1, B, H), jnp.float32)

    # Whole sequence in one grid invocation (default for small T).
    output, (h_n, c_n) = encoder_forward(params, x, (h0, c0))
    jax.block_until_ready((output, h_n, c_n))

    ref_out, (ref_h, ref_c) = _reference_lstm(params, x, (h0, c0))
    # bf16 MXU inputs (f32 accumulation / f32 recurrent state) -> loose tolerance.
    TOL = 5e-2
    assert jnp.allclose(output, ref_out, atol=TOL), "output mismatch"
    assert jnp.allclose(h_n, ref_h, atol=TOL), "h_n mismatch"
    assert jnp.allclose(c_n, ref_c, atol=TOL), "c_n mismatch"

    # Also exercise the multi-chunk (grid > 1, carried scratch state) path.
    out2, (h2, c2) = encoder_forward(params, x, (h0, c0), time_chunk=2)
    jax.block_until_ready((out2, h2, c2))
    assert jnp.allclose(out2, ref_out, atol=TOL), "chunked output mismatch"
    assert jnp.allclose(h2, ref_h, atol=TOL), "chunked h_n mismatch"
    assert jnp.allclose(c2, ref_c, atol=TOL), "chunked c_n mismatch"

    print("KERNEL_OK")
</pallas_src>

<mosaic_0001>
module attributes {stable_mosaic.version = 11 : i64} {
  func.func @_input_proj_kernel(%arg0: i32, %arg1: memref<16x32xbf16, #tpu.memory_space<vmem>>, %arg2: memref<32x512xbf16, #tpu.memory_space<vmem>>, %arg3: memref<1x512xf32, #tpu.memory_space<vmem>>, %arg4: memref<16x512xf32, #tpu.memory_space<vmem>>) attributes {dimension_semantics = [#tpu.dimension_semantics<parallel>], iteration_bounds = array<i64: 1>, scalar_prefetch = 0 : i64, scratch_operands = 0 : i64, tpu.core_type = #tpu.core_type<tc>, window_params = [{transform_indices = @transform_0, window_bounds = array<i64: 16, 32>}, {pipeline_mode = #tpu.pipeline_mode<synchronous>, transform_indices = @transform_1, window_bounds = array<i64: 32, 512>}, {pipeline_mode = #tpu.pipeline_mode<synchronous>, transform_indices = @transform_2, window_bounds = array<i64: 1, 512>}, {transform_indices = @transform_3, window_bounds = array<i64: 16, 512>}]} {
    %c0 = arith.constant 0 : index
    %c0_0 = arith.constant 0 : index
    %0 = vector.load %arg1[%c0, %c0_0] : memref<16x32xbf16, #tpu.memory_space<vmem>>, vector<16x32xbf16>
    %c0_1 = arith.constant 0 : index
    %c0_2 = arith.constant 0 : index
    %1 = vector.load %arg2[%c0_1, %c0_2] : memref<32x512xbf16, #tpu.memory_space<vmem>>, vector<32x512xbf16>
    %cst = arith.constant dense<0.000000e+00> : vector<16x512xf32>
    %2 = tpu.matmul %0, %1, %cst {dimension_numbers = #tpu.dot_dimension_numbers<[1], [0], [0], [1], [0, 0, 1, 1], [], []>} : vector<16x32xbf16>, vector<32x512xbf16>, vector<16x512xf32> -> vector<16x512xf32>
    %c0_3 = arith.constant 0 : index
    %c0_4 = arith.constant 0 : index
    %3 = vector.load %arg3[%c0_3, %c0_4] : memref<1x512xf32, #tpu.memory_space<vmem>>, vector<1x512xf32>
    %4 = vector.broadcast %3 : vector<1x512xf32> to vector<16x512xf32>
    %5 = arith.addf %2, %4 : vector<16x512xf32>
    %c0_5 = arith.constant 0 : index
    %c0_6 = arith.constant 0 : index
    %6 = vector.load %arg4[%c0_5, %c0_6] : memref<16x512xf32, #tpu.memory_space<vmem>>, vector<16x512xf32>
    tpu.vector_store %arg4[%c0_5, %c0_6], %5 {strides = array<i32>} : memref<16x512xf32, #tpu.memory_space<vmem>>, vector<16x512xf32>,
    return
  }
  func.func @transform_0(%arg0: i32) -> (i32, i32) {
    %c0_i32 = arith.constant 0 : i32
    %c0_i32_0 = arith.constant 0 : i32
    return %arg0, %c0_i32 : i32, i32
  }
  func.func @transform_1(%arg0: i32) -> (i32, i32) {
    %c0_i32 = arith.constant 0 : i32
    %c0_i32_0 = arith.constant 0 : i32
    %c0_i32_1 = arith.constant 0 : i32
    return %c0_i32, %c0_i32_0 : i32, i32
  }
  func.func @transform_2(%arg0: i32) -> (i32, i32) {
    %c0_i32 = arith.constant 0 : i32
    %c0_i32_0 = arith.constant 0 : i32
    %c0_i32_1 = arith.constant 0 : i32
    return %c0_i32, %c0_i32_0 : i32, i32
  }
  func.func @transform_3(%arg0: i32) -> (i32, i32) {
    %c0_i32 = arith.constant 0 : i32
    %c0_i32_0 = arith.constant 0 : i32
    return %arg0, %c0_i32 : i32, i32
  }
}

</mosaic_0001>

<bundles_post_ra>
// kernel: tpu_custom_call.1
= control target key start
LH: loop header
LB: loop body
LE: loop exit
PB: predicated region body
PF: predicated region fallthrough
CT: control target
= control target key end

     0   :  { %8 = vsyncpa [#allocation3], 0  ;;  %s412_s0 = inlined_call_operand.hbm [shape: bf16[16,32], index: 0, kind: input, shape index: {}]   ;;  %s413_s1 = inlined_call_operand.hbm [shape: bf16[32,512], index: 1, kind: input, shape index: {}]   ;;  %s414_s2 = inlined_call_operand.hbm [shape: f32[1,512], index: 2, kind: input, shape index: {}]   ;;  %s415_s3 = inlined_call_operand.hbm [shape: f32[16,512], index: 3, kind: output, shape index: {}]  }
   0x1   :  { %9 = vsyncpa [#allocation6], 0 }
   0x2   :  { %10 = vsyncpa [#allocation4], 0  ;;  %s369_s12 = smov [#allocation5]  }
   0x3   :  { %s28_s13 = sshll.u32 %s369_s12, 4  ;;  %s29_s13 = int_to_ptr.vmem [resolvable:$true] %s28_s13 }
   0x4   :  { %s291_s14 = scalar_lea.vmem %s29_s13, 1024  ;;  %p296_p1 = scmp.lt.s32.totalorder %s29_s13, %s29_s13 }
   0x5   :  { %p292_p0 = scmp.ne.s32.totalorder %s29_s13, %s291_s14  ;;  %p297_p2 = scmp.lt.s32.totalorder %s291_s14, %s291_s14 }
   0x7   :  { %p298_p3 = por %p297_p2, %p296_p1 }
   0x9   :  { %p299_p4 = pnand %p298_p3, %p292_p0 }
   0xb   :  { %302 = shalt.err (!%p299_p4)
}
   0xc   :  { %s370_s15 = smov 256   ;;  %s371_s16 = smov 16  }
   0xd   :  { %34 = dma.hbm_to_vmem [thread:$0]  %s413_s1, 1024, %s29_s13, [#allocation6], %s370_s15, %s370_s15, %s371_s16  }
   0xe   :  { %s372_s19 = smov [#allocation2]  }
   0xf   :  { %s16_s20 = sshll.u32 %s372_s19, 4  ;;  %s17_s20 = int_to_ptr.vmem [resolvable:$true] %s16_s20 }
  0x10   :  { %s311_s21 = scalar_lea.vmem %s17_s20, 128  ;;  %p316_p6 = scmp.lt.s32.totalorder %s17_s20, %s17_s20 }
  0x11   :  { %p312_p5 = scmp.ne.s32.totalorder %s17_s20, %s311_s21  ;;  %p317_p7 = scmp.lt.s32.totalorder %s311_s21, %s311_s21 }
  0x13   :  { %p318_p8 = por %p317_p7, %p316_p6 }
  0x15   :  { %p319_p9 = pnand %p318_p8, %p312_p5 }
  0x17   :  { %322 = shalt.err (!%p319_p9)
}
  0x18   :  { %s373_s22 = smov 64   ;;  %s374_s23 = smov 4  }
  0x19   :  { %22 = dma.hbm_to_vmem [thread:$0]  %s412_s0, 128, %s17_s20, [#allocation3], %s373_s22, %s373_s22, %s374_s23  }
  0x1a   :  { %s375_s26 = smov [#allocation7]  }
  0x1b   :  { %s41_s27 = sshll.u32 %s375_s26, 4  ;;  %s42_s27 = int_to_ptr.vmem [resolvable:$true] %s41_s27 }
  0x1c   :  { %s331_s1 = scalar_lea.vmem %s42_s27, 64  ;;  %p336_p11 = scmp.lt.s32.totalorder %s42_s27, %s42_s27 }
  0x1d   :  { %p332_p10 = scmp.ne.s32.totalorder %s42_s27, %s331_s1  ;;  %p337_p12 = scmp.lt.s32.totalorder %s331_s1, %s331_s1 }
  0x1f   :  { %p338_p13 = por %p337_p12, %p336_p11 }
  0x21   :  { %p339_p0 = pnand %p338_p13, %p332_p10 }
  0x23   :  { %342 = shalt.err (!%p339_p0)
}
  0x24   :  { %44 = dma.hbm_to_vmem [thread:$0]  %s414_s2, 64, %s42_s27, [#allocation6]  }
  0x25   :  { %363 = dma.done.wait [#allocation3], 128  }
  0x26   :  { %364 = vsyncadd [#allocation3], 4294967168 }
  0x27   :  { %365 = dma.done.wait [#allocation6], 1088  }
  0x28   :  { %366 = vsyncadd [#allocation6], 4294966208  ;;  %v376_v0 = vmov 0   ;;  %v270_v1 = vld [vmem:[#allocation5 + $0x24] ss:$16 sps:$4 sm:$0xff]   ;;  %v282_v9 = vld [vmem:[#allocation2] sm:$0xff]   ;;  %v67_v10 = vlaneseq }
  0x29   :  { %168 = vmatprep.mubr.bf16.mxu0 %v376_v0  ;;  %211 = vmatprep.mubr.bf16.mxu1 %v376_v0  ;;  %v272_v2 = vld [vmem:[#allocation5 + $0x2c] ss:$16 sps:$4 sm:$0xff]   ;;  %v274_v3 = vld [vmem:[#allocation5 + $0x20] ss:$16 sps:$4 sm:$0xff]   ;;  %v275_v4 = vld [vmem:[#allocation5 + $0x28] ss:$16 sps:$4 sm:$0xff]  }
  0x2a   :  { %148 = vmatprep.subr.bf16.mxu0 %v270_v1  ;;  %191 = vmatprep.subr.bf16.mxu1 %v272_v2  ;;  %v276_v5 = vld [vmem:[#allocation5 + $0x4] ss:$16 sps:$4 sm:$0xff]   ;;  %v278_v6 = vld [vmem:[#allocation5 + $0xc] ss:$16 sps:$4 sm:$0xff]   ;;  %v280_v7 = vld [vmem:[#allocation5] ss:$16 sps:$4 sm:$0xff]  }
  0x2b   :  { %149 = vmatpush1.bf16.msra.mxu0 %v274_v3  ;;  %192 = vmatpush1.bf16.msra.mxu1 %v275_v4  ;;  %v281_v8 = vld [vmem:[#allocation5 + $0x8] ss:$16 sps:$4 sm:$0xff]   ;;  %vm132_vm0 = vcmask 261120   ;;  %v68_v11 = vshrl.u32 %v67_v10, 7  ;;  %v65_v14 = vld [vmem:[#allocation7] sm:$0xf] }
  0x2c   :  { %150 = vmatprep.subr.bf16.mxu0 %v276_v5  ;;  %193 = vmatprep.subr.bf16.mxu1 %v278_v6  ;;  %s377_s0 = smov [#allocation8]  }
  0x2d   :  { %v69_v12 = vsub.s32 0, %v68_v11  ;;  %v77_v13 = vsub.s32 2, %v68_v11  ;;  %v73_v15 = vsub.s32 1, %v68_v11  ;;  %v81_v16 = vsub.s32 3, %v68_v11  ;;  %s235_s2 = sshll.u32 %s377_s0, 4  ;;  %s236_s2 = int_to_ptr.vmem [resolvable:$true] %s235_s2 }
  0x2e   :  { %s343_s30 = scalar_lea.vmem %s236_s2, 1024  ;;  %p348_p2 = scmp.lt.s32.totalorder %s236_s2, %s236_s2 }
  0x2f   :  { %151 = vmatpush1.bf16.msra.mxu0 %v280_v7  ;;  %194 = vmatpush1.bf16.msra.mxu1 %v281_v8  ;;  %v70_v17 = vrot.slane %v65_v14, %v69_v12  ;;  %v78_v18 = vrot.slane %v65_v14, %v77_v13  ;;  %v74_v19 = vrot.slane %v65_v14, %v73_v15  ;;  %p344_p1 = scmp.ne.s32.totalorder %s236_s2, %s343_s30  ;;  %p349_p3 = scmp.lt.s32.totalorder %s343_s30, %s343_s30 }
  0x30   :  { %v82_v20 = vrot.slane %v65_v14, %v81_v16 }
  0x31   :  { %p350_p4 = por %p349_p3, %p348_p2 }
  0x32   :  { %257 = vmatmul.mubr.msk.bf16.vlgmr.msra.gmra.mxu0 %vm132_vm0, %v282_v9  ;;  %258 = vmatmul.mubr.msk.bf16.vlgmr.msra.gmra.mxu1 %vm132_vm0, %v282_v9 }
  0x33   :  { %p351_p5 = pnand %p350_p4, %p344_p1 }
  0xf2   :  { %v170_v21 = vpop.f32.mrf.mxu0  ;;  %v213_v22 = vpop.f32.mrf.mxu1 }
  0xf3   :  { %v171_v23 = vadd.f32 %v170_v21, %v70_v17  ;;  %v214_v24 = vadd.f32 %v213_v22, %v78_v18 }
  0xf4   :  { %v172_v25 = vpop.f32.mrf.mxu0  ;;  %v215_v26 = vpop.f32.mrf.mxu1 }
  0xf5   :  { %222 = vst [vmem:[#allocation8] sm:$0xff] %v171_v23  ;;  %224 = vst [vmem:[#allocation8 + $0x10] sm:$0xff] %v214_v24  ;;  %v173_v27 = vadd.f32 %v172_v25, %v74_v19  ;;  %v216_v28 = vadd.f32 %v215_v26, %v82_v20 }
  0xf6   :  { %v174_v29 = vpop.f32.mrf.mxu0  ;;  %v217_v30 = vpop.f32.mrf.mxu1 }
  0xf7   :  { %223 = vst [vmem:[#allocation8 + $0x8] sm:$0xff] %v173_v27  ;;  %225 = vst [vmem:[#allocation8 + $0x18] sm:$0xff] %v216_v28  ;;  %v175_v31 = vadd.f32 %v174_v29, %v70_v17  ;;  %v218_v32 = vadd.f32 %v217_v30, %v78_v18 }
  0xf8   :  { %v176_v33 = vpop.f32.mrf.mxu0  ;;  %v219_v34 = vpop.f32.mrf.mxu1 }
  0xf9   :  { %226 = vst [vmem:[#allocation8 + $0x20] sm:$0xff] %v175_v31  ;;  %228 = vst [vmem:[#allocation8 + $0x30] sm:$0xff] %v218_v32  ;;  %v177_v35 = vadd.f32 %v176_v33, %v74_v19  ;;  %v220_v36 = vadd.f32 %v219_v34, %v82_v20 }
  0xfb   :  { %227 = vst [vmem:[#allocation8 + $0x28] sm:$0xff] %v177_v35  ;;  %229 = vst [vmem:[#allocation8 + $0x38] sm:$0xff] %v220_v36 }
  0xfc   :  { %354 = shalt.err (!%p351_p5)
}
  0xfd   :  { %s378_s4 = smov 512   ;;  %s379_s5 = smov 32  }
  0xfe   :  { %241 = dma.vmem_to_hbm [thread:$0]  %s236_s2, 1024, %s415_s3, [#allocation4], %s378_s4, %s378_s4, %s379_s5  }
  0xff   :  { %367 = dma.done.wait [#allocation4], 1024  }
 0x100   :  { %368 = vsyncadd [#allocation4], 4294966272 }
 0x101   :  { %245 = vsyncpa [#allocation3], 1 }
 0x102   :  { %246 = vsyncpa [#allocation6], 1 }
 0x103   :  { %247 = vsyncpa [#allocation4], 1 }

</bundles_post_ra>
